<compile_context>
chip_gen: v7x
topology: tpu7x:2x2x1
jax: 0.10.0
libtpu: 0.0.40
codegen_flags: <defaults>
</compile_context>

<pallas_src>
import functools

import jax
import jax.numpy as jnp
from jax.experimental import pallas as pl
from jax.experimental.pallas import tpu as pltpu


def _round_up(x: int, m: int) -> int:
    return ((x + m - 1) // m) * m


def mlp_kernel(x_ref, w1_ref, b1_ref, w2_ref, b2_ref, o_ref):
    # out = relu(x @ W1 + b1) @ W2 + b2   -- one batch tile per grid step, all VMEM-resident.
    x = x_ref[...]
    h = jnp.dot(x, w1_ref[...], preferred_element_type=jnp.float32) + b1_ref[...]
    h = jnp.maximum(h, 0.0)
    y = jnp.dot(h.astype(w2_ref.dtype), w2_ref[...],
                preferred_element_type=jnp.float32) + b2_ref[...]
    o_ref[...] = y.astype(o_ref.dtype)


@functools.partial(jax.jit, static_argnames=("block_batch",))
def neural_net_forward(x, w1, b1, w2, b2, *, block_batch: int = 256):
    """x: (B, D_in); w1: (D_in, H); b1: (1, H); w2: (H, C); b2: (1, C) -> (B, C)."""
    B, D_in = x.shape
    H = w1.shape[1]
    C = w2.shape[1]
    dtype = x.dtype

    # --- Lane-align the classes/output dim (C=2 would force masked vst + padded DMA). ---
    C_pad = _round_up(max(C, 128), 128)
    if C_pad != C:
        w2 = jnp.pad(w2, ((0, 0), (0, C_pad - C)))
        b2 = jnp.pad(b2, ((0, 0), (0, C_pad - C)))

    # --- Batch tiling: TB multiple of 8 (f32 sublane); pad B up to a whole number of tiles. ---
    TB = min(block_batch, _round_up(B, 8))
    B_pad = _round_up(B, TB)
    if B_pad != B:
        x = jnp.pad(x, ((0, B_pad - B), (0, 0)))
    grid = (B_pad // TB,)

    itemsize = jnp.dtype(dtype).itemsize
    # VMEM budget (per grid step, double-buffered x/out + resident weights + hidden tile).
    resident_bytes = (
        2 * (TB * D_in + TB * C_pad) * itemsize   # pipelined x and out tiles
        + (D_in * H + H + H * C_pad + C_pad) * itemsize  # resident weights/biases
        + TB * H * 4                               # f32 hidden activation
    )
    # Stay within v7x's smaller VMEM; generous headroom for compiler scratch.
    vmem_limit = max(resident_bytes * 2, 16 * 1024 * 1024)
    vmem_limit = min(vmem_limit, 32 * 1024 * 1024)

    flops = 2 * B_pad * (D_in * H + H * C_pad)
    bytes_accessed = (
        B_pad * D_in + D_in * H + H + H * C_pad + C_pad + B_pad * C_pad
    ) * itemsize

    out = pl.pallas_call(
        mlp_kernel,
        out_shape=jax.ShapeDtypeStruct((B_pad, C_pad), dtype),
        grid_spec=pltpu.PrefetchScalarGridSpec(
            num_scalar_prefetch=0,
            grid=grid,
            in_specs=[
                pl.BlockSpec((TB, D_in), lambda i: (i, 0)),   # x: tiled over batch
                pl.BlockSpec((D_in, H), lambda i: (0, 0)),    # w1: VMEM-resident
                pl.BlockSpec((1, H), lambda i: (0, 0)),       # b1: VMEM-resident
                pl.BlockSpec((H, C_pad), lambda i: (0, 0)),   # w2: VMEM-resident
                pl.BlockSpec((1, C_pad), lambda i: (0, 0)),   # b2: VMEM-resident
            ],
            out_specs=pl.BlockSpec((TB, C_pad), lambda i: (i, 0)),
        ),
        compiler_params=pltpu.CompilerParams(
            dimension_semantics=("parallel",),   # batch axis shards across TCs on v7x
            vmem_limit_bytes=int(vmem_limit),
        ),
        cost_estimate=pl.CostEstimate(
            flops=flops, transcendentals=0, bytes_accessed=bytes_accessed
        ),
    )(x, w1, b1, w2, b2)

    # Strip batch / class padding.
    return out[:B, :C]


def init_linear_params(key, fan_in, fan_out):
    """Mimic PyTorch nn.Linear default init: U(-1/sqrt(fan_in), 1/sqrt(fan_in))."""
    kw, kb = jax.random.split(key)
    bound = 1.0 / jnp.sqrt(jnp.float32(fan_in))
    # Stored as (fan_in, fan_out) == PyTorch weight.T
    w = jax.random.uniform(kw, (fan_in, fan_out), jnp.float32, -bound, bound)
    b = jax.random.uniform(kb, (1, fan_out), jnp.float32, -bound, bound)
    return w, b


if __name__ == "__main__":
    # Small, lane-aligned shapes consistent with the module's forward:
    # (batch, input_size) -> (batch, num_classes).
    batch = 128
    input_size = 128     # multiple of 128 (lane width)
    hidden_size = 256    # multiple of 128
    num_classes = 2      # padded to 128 inside the kernel, sliced back in the wrapper

    key = jax.random.PRNGKey(0)
    kx, k1, k2 = jax.random.split(key, 3)

    x = jax.random.normal(kx, (batch, input_size), jnp.float32)
    w1, b1 = init_linear_params(k1, input_size, hidden_size)
    w2, b2 = init_linear_params(k2, hidden_size, num_classes)

    out = neural_net_forward(x, w1, b1, w2, b2, block_batch=64)
    out = jax.block_until_ready(out)

    # Pure-JAX reference check of the same forward pass.
    ref = jnp.maximum(x @ w1 + b1, 0.0) @ w2 + b2
    assert out.shape == (batch, num_classes)
    assert jnp.allclose(out, ref, atol=1e-3, rtol=1e-3)

    # TODO(synk): at real model sizes, cast x/w1/w2 to bf16 (f32 accumulation kept via
    # preferred_element_type) and consider fp8 weights on v7x; f32 kept here for the tiny demo.
    print("KERNEL_OK")
</pallas_src>

<mosaic_0001>
module attributes {stable_mosaic.version = 11 : i64} {
  func.func @mlp_kernel(%arg0: i32, %arg1: memref<64x128xf32, #tpu.memory_space<vmem>>, %arg2: memref<128x256xf32, #tpu.memory_space<vmem>>, %arg3: memref<1x256xf32, #tpu.memory_space<vmem>>, %arg4: memref<256x128xf32, #tpu.memory_space<vmem>>, %arg5: memref<1x128xf32, #tpu.memory_space<vmem>>, %arg6: memref<64x128xf32, #tpu.memory_space<vmem>>) attributes {dimension_semantics = [#tpu.dimension_semantics<parallel>], iteration_bounds = array<i64: 2>, scalar_prefetch = 0 : i64, scratch_operands = 0 : i64, tpu.core_type = #tpu.core_type<tc>, window_params = [{transform_indices = @transform_0, window_bounds = array<i64: 64, 128>}, {pipeline_mode = #tpu.pipeline_mode<synchronous>, transform_indices = @transform_1, window_bounds = array<i64: 128, 256>}, {pipeline_mode = #tpu.pipeline_mode<synchronous>, transform_indices = @transform_2, window_bounds = array<i64: 1, 256>}, {pipeline_mode = #tpu.pipeline_mode<synchronous>, transform_indices = @transform_3, window_bounds = array<i64: 256, 128>}, {pipeline_mode = #tpu.pipeline_mode<synchronous>, transform_indices = @transform_4, window_bounds = array<i64: 1, 128>}, {transform_indices = @transform_5, window_bounds = array<i64: 64, 128>}]} {
    %c0 = arith.constant 0 : index
    %c0_0 = arith.constant 0 : index
    %0 = vector.load %arg1[%c0, %c0_0] : memref<64x128xf32, #tpu.memory_space<vmem>>, vector<64x128xf32>
    %c0_1 = arith.constant 0 : index
    %c0_2 = arith.constant 0 : index
    %1 = vector.load %arg2[%c0_1, %c0_2] : memref<128x256xf32, #tpu.memory_space<vmem>>, vector<128x256xf32>
    %cst = arith.constant dense<0.000000e+00> : vector<64x256xf32>
    %2 = tpu.matmul %0, %1, %cst {dimension_numbers = #tpu.dot_dimension_numbers<[1], [0], [0], [1], [0, 0, 1, 1], [], []>} : vector<64x128xf32>, vector<128x256xf32>, vector<64x256xf32> -> vector<64x256xf32>
    %c0_3 = arith.constant 0 : index
    %c0_4 = arith.constant 0 : index
    %3 = vector.load %arg3[%c0_3, %c0_4] : memref<1x256xf32, #tpu.memory_space<vmem>>, vector<1x256xf32>
    %4 = vector.broadcast %3 : vector<1x256xf32> to vector<64x256xf32>
    %5 = arith.addf %2, %4 : vector<64x256xf32>
    %cst_5 = arith.constant 0.000000e+00 : f32
    %6 = vector.broadcast %cst_5 : f32 to vector<64x256xf32>
    %7 = arith.maximumf %5, %6 : vector<64x256xf32>
    %c0_6 = arith.constant 0 : index
    %c0_7 = arith.constant 0 : index
    %8 = vector.load %arg4[%c0_6, %c0_7] : memref<256x128xf32, #tpu.memory_space<vmem>>, vector<256x128xf32>
    %cst_8 = arith.constant dense<0.000000e+00> : vector<64x128xf32>
    %9 = tpu.matmul %7, %8, %cst_8 {dimension_numbers = #tpu.dot_dimension_numbers<[1], [0], [0], [1], [0, 0, 1, 1], [], []>} : vector<64x256xf32>, vector<256x128xf32>, vector<64x128xf32> -> vector<64x128xf32>
    %c0_9 = arith.constant 0 : index
    %c0_10 = arith.constant 0 : index
    %10 = vector.load %arg5[%c0_9, %c0_10] : memref<1x128xf32, #tpu.memory_space<vmem>>, vector<1x128xf32>
    %11 = vector.broadcast %10 : vector<1x128xf32> to vector<64x128xf32>
    %12 = arith.addf %9, %11 : vector<64x128xf32>
    %c0_11 = arith.constant 0 : index
    %c0_12 = arith.constant 0 : index
    %13 = vector.load %arg6[%c0_11, %c0_12] : memref<64x128xf32, #tpu.memory_space<vmem>>, vector<64x128xf32>
    tpu.vector_store %arg6[%c0_11, %c0_12], %12 {strides = array<i32>} : memref<64x128xf32, #tpu.memory_space<vmem>>, vector<64x128xf32>,
    return
  }
  func.func @transform_0(%arg0: i32) -> (i32, i32) {
    %c0_i32 = arith.constant 0 : i32
    %c0_i32_0 = arith.constant 0 : i32
    return %arg0, %c0_i32 : i32, i32
  }
  func.func @transform_1(%arg0: i32) -> (i32, i32) {
    %c0_i32 = arith.constant 0 : i32
    %c0_i32_0 = arith.constant 0 : i32
    %c0_i32_1 = arith.constant 0 : i32
    return %c0_i32, %c0_i32_0 : i32, i32
  }
  func.func @transform_2(%arg0: i32) -> (i32, i32) {
    %c0_i32 = arith.constant 0 : i32
    %c0_i32_0 = arith.constant 0 : i32
    %c0_i32_1 = arith.constant 0 : i32
    return %c0_i32, %c0_i32_0 : i32, i32
  }
  func.func @transform_3(%arg0: i32) -> (i32, i32) {
    %c0_i32 = arith.constant 0 : i32
    %c0_i32_0 = arith.constant 0 : i32
    %c0_i32_1 = arith.constant 0 : i32
    return %c0_i32, %c0_i32_0 : i32, i32
  }
  func.func @transform_4(%arg0: i32) -> (i32, i32) {
    %c0_i32 = arith.constant 0 : i32
    %c0_i32_0 = arith.constant 0 : i32
    %c0_i32_1 = arith.constant 0 : i32
    return %c0_i32, %c0_i32_0 : i32, i32
  }
  func.func @transform_5(%arg0: i32) -> (i32, i32) {
    %c0_i32 = arith.constant 0 : i32
    %c0_i32_0 = arith.constant 0 : i32
    return %arg0, %c0_i32 : i32, i32
  }
}

</mosaic_0001>

<bundles_post_ra>
// kernel: neural_net_forward.1
= control target key start
LH: loop header
LB: loop body
LE: loop exit
PB: predicated region body
PF: predicated region fallthrough
CT: control target
= control target key end

     0   :  { %s797_s18 = smov 0   ;;  %s1055_s0 = inlined_call_operand.vmem [shape: f32[128,128], index: 0, kind: input, shape index: {}]   ;;  %s1056_s1 = inlined_call_operand.vmem [shape: f32[128,256], index: 1, kind: input, shape index: {}]   ;;  %s1057_s2 = inlined_call_operand.vmem [shape: f32[1,256], index: 2, kind: input, shape index: {}]   ;;  %s1058_s3 = inlined_call_operand.vmem [shape: f32[256,128], index: 3, kind: input, shape index: {}]   ;;  %s1059_s4 = inlined_call_operand.vmem [shape: f32[1,128], index: 4, kind: input, shape index: {}]   ;;  %s1060_s5 = inlined_call_operand.vmem [shape: f32[128,128], index: 5, kind: output, shape index: {}]  }
   0x1 LB: > { %s617_s19 = sadd.s32 4294967295, %s764_s18   ;;  %p621_p0 = scmp.ge.s32.totalorder %s764_s18, 1  ;;  %s764_s18 = sphi %s797_s18, %s15_s18  }
   0x2   : > { %p188_p1 = scmp.lt.s32.totalorder %s764_s18, 3 }
   0x4   : > { %p189_p2 = pnand %p621_p0, %p188_p1 }
   0x5   : > { %v237_v0 = vld [vmem:[%s1056_s1 + $0x8] sm:$0xff] (!%p189_p2)  ;;  %v239_v1 = vld [vmem:[%s1056_s1 + $0x18] sm:$0xff] (!%p189_p2)  ;;  %v236_v2 = vld [vmem:[%s1056_s1] sm:$0xff] (!%p189_p2)  ;;  %v766_v7 = vmov (!%p189_p2), 0.0   ;;  %s889_s28 = sshll.u32 (!%p189_p2), %s617_s19, 3 }
   0x6   : > { %192 = sbr.rel (%p189_p2) target bundleno = 504 (0x1f8), region = 40  ;;  %v685_v3 = vpack.c.bf16 (!%p189_p2), %v239_v1, %v237_v0  ;;  %v238_v4 = vld [vmem:[%s1056_s1 + $0x10] sm:$0xff] (!%p189_p2)  ;;  %v241_v5 = vld [vmem:[%s1056_s1 + $0x28] sm:$0xff] (!%p189_p2)  ;;  %v243_v6 = vld [vmem:[%s1056_s1 + $0x38] sm:$0xff] (!%p189_p2)  ;;  %344 = vmatprep.mubr.f32.mxu0 (!%p189_p2), %v766_v7  ;;  %p217_p3 = scmp.lt.s32.totalorder (!%p189_p2), %s889_s28, 15 }
   0x7   : > { %v687_v8 = vpack.c.bf16 (!%p189_p2), %v238_v4, %v236_v2  ;;  %v689_v9 = vpack.c.bf16 (!%p189_p2), %v243_v6, %v241_v5  ;;  %v240_v10 = vld [vmem:[%s1056_s1 + $0x20] sm:$0xff] (!%p189_p2)  ;;  %v242_v11 = vld [vmem:[%s1056_s1 + $0x30] sm:$0xff] (!%p189_p2)  ;;  %v245_v12 = vld [vmem:[%s1056_s1 + $0x48] sm:$0xff] (!%p189_p2) }
   0x8   : > { %686 = vmatprep.subr.bf16.mxu0 (!%p189_p2), %v685_v3  ;;  %v247_v13 = vld [vmem:[%s1056_s1 + $0x58] sm:$0xff] (!%p189_p2)  ;;  %v691_v14 = vpack.c.bf16 (!%p189_p2), %v242_v11, %v240_v10  ;;  %v244_v16 = vld [vmem:[%s1056_s1 + $0x40] sm:$0xff] (!%p189_p2)  ;;  %v246_v17 = vld [vmem:[%s1056_s1 + $0x50] sm:$0xff] (!%p189_p2) }
   0x9   : > { %688 = vmatpush1.bf16.msra.mxu0 (!%p189_p2), %v687_v8  ;;  %v693_v15 = vpack.c.bf16 (!%p189_p2), %v247_v13, %v245_v12  ;;  %v249_v18 = vld [vmem:[%s1056_s1 + $0x68] sm:$0xff] (!%p189_p2)  ;;  %v251_v19 = vld [vmem:[%s1056_s1 + $0x78] sm:$0xff] (!%p189_p2)  ;;  %v695_v20 = vpack.c.bf16 (!%p189_p2), %v246_v17, %v244_v16  ;;  %v248_v22 = vld [vmem:[%s1056_s1 + $0x60] sm:$0xff] (!%p189_p2) }
   0xa   : > { %690 = vmatprep.subr.bf16.mxu0 (!%p189_p2), %v689_v9  ;;  %v697_v21 = vpack.c.bf16 (!%p189_p2), %v251_v19, %v249_v18  ;;  %v250_v23 = vld [vmem:[%s1056_s1 + $0x70] sm:$0xff] (!%p189_p2)  ;;  %v253_v24 = vld [vmem:[%s1056_s1 + $0x88] sm:$0xff] (!%p189_p2)  ;;  %v255_v25 = vld [vmem:[%s1056_s1 + $0x98] sm:$0xff] (!%p189_p2) }
   0xb   : > { %v699_v26 = vpack.c.bf16 (!%p189_p2), %v250_v23, %v248_v22  ;;  %v252_v27 = vld [vmem:[%s1056_s1 + $0x80] sm:$0xff] (!%p189_p2)  ;;  %v254_v28 = vld [vmem:[%s1056_s1 + $0x90] sm:$0xff] (!%p189_p2)  ;;  %v257_v29 = vld [vmem:[%s1056_s1 + $0xa8] sm:$0xff] (!%p189_p2)  ;;  %v701_v30 = vpack.c.bf16 (!%p189_p2), %v255_v25, %v253_v24 }
   0xc   : > { %v259_v31 = vld [vmem:[%s1056_s1 + $0xb8] sm:$0xff] (!%p189_p2)  ;;  %v425_v32 = vld [vmem:[%s1058_s3 + $0x80] sm:$0xff] (!%p189_p2)  ;;  %v426_v33 = vld [vmem:[%s1058_s3 + $0x88] sm:$0xff] (!%p189_p2)  ;;  %v703_v42 = vpack.c.bf16 (!%p189_p2), %v254_v28, %v252_v27 }
   0xd   : > { %692 = vmatpush1.bf16.msra.mxu0 %v691_v14  ;;  %v717_v34 = vpack.c.bf16 %v426_v33, %v425_v32  ;;  %v409_v35 = vld [vmem:[%s1058_s3] sm:$0xff]  ;;  %v410_v36 = vld [vmem:[%s1058_s3 + $0x8] sm:$0xff]  ;;  %v427_v37 = vld [vmem:[%s1058_s3 + $0x90] sm:$0xff]  ;;  %v705_v46 = vpack.c.bf16 %v259_v31, %v257_v29  ;;  %s1062_s28 = smov (!%p217_p3, %s889_s28), 15 }
   0xe   : > { %694 = vmatprep.subr.bf16.mxu0 %v693_v15  ;;  %v719_v38 = vpack.c.bf16 %v410_v36, %v409_v35  ;;  %v428_v39 = vld [vmem:[%s1058_s3 + $0x98] sm:$0xff]  ;;  %v411_v40 = vld [vmem:[%s1058_s3 + $0x10] sm:$0xff]  ;;  %v429_v44 = vld [vmem:[%s1058_s3 + $0xa0] sm:$0xff]  ;;  %s623_s29 = sshll.u32 %s1062_s28, 3 }
   0xf   : > { %v412_v41 = vld [vmem:[%s1058_s3 + $0x18] sm:$0xff]  ;;  %718 = vmatprep.subr.bf16.mxu1 %v717_v34  ;;  %v721_v43 = vpack.c.bf16 %v428_v39, %v427_v37  ;;  %v430_v45 = vld [vmem:[%s1058_s3 + $0xa8] sm:$0xff]  ;;  %v256_v47 = vld [vmem:[%s1056_s1 + $0xa0] sm:$0xff]  ;;  %s984_s14 = scalar_lea.vmem %s1055_s0, %s623_s29  ;;  %s1042_s21 = scalar_lea.vmem %s1060_s5, %s623_s29 }
  0x10   : > { %v258_v48 = vld [vmem:[%s1056_s1 + $0xb0] sm:$0xff]  ;;  %v261_v49 = vld [vmem:[%s1056_s1 + $0xc8] sm:$0xff]  ;;  %720 = vmatpush3.bf16.msra.mxu1 %v719_v38  ;;  %v723_v50 = vpack.c.bf16 %v412_v41, %v411_v40  ;;  %v263_v51 = vld [vmem:[%s1056_s1 + $0xd8] sm:$0xff]  ;;  %v725_v52 = vpack.c.bf16 %v430_v45, %v429_v44  ;;  %v270_v41 = vlaneseq }
  0x11   : > { %696 = vmatpush1.bf16.msra.mxu0 %v695_v20  ;;  %722 = vmatprep.subr.bf16.mxu1 %v721_v43  ;;  %v413_v53 = vld [vmem:[%s1058_s3 + $0x20] sm:$0xff]  ;;  %v414_v54 = vld [vmem:[%s1058_s3 + $0x28] sm:$0xff]  ;;  %v431_v55 = vld [vmem:[%s1058_s3 + $0xb0] sm:$0xff]  ;;  %v707_v57 = vpack.c.bf16 %v258_v48, %v256_v47  ;;  %v709_v58 = vpack.c.bf16 %v263_v51, %v261_v49 }
  0x12   : > { %698 = vmatprep.subr.bf16.mxu0 %v697_v21  ;;  %v432_v56 = vld [vmem:[%s1058_s3 + $0xb8] sm:$0xff]  ;;  %v260_v59 = vld [vmem:[%s1056_s1 + $0xc0] sm:$0xff]  ;;  %v262_v60 = vld [vmem:[%s1056_s1 + $0xd0] sm:$0xff]  ;;  %v727_v62 = vpack.c.bf16 %v414_v54, %v413_v53 }
  0x13   : > { %v265_v61 = vld [vmem:[%s1056_s1 + $0xe8] sm:$0xff]  ;;  %v267_v63 = vld [vmem:[%s1056_s1 + $0xf8] sm:$0xff]  ;;  %v729_v0 = vpack.c.bf16 %v432_v56, %v431_v55  ;;  %v415_v1 = vld [vmem:[%s1058_s3 + $0x30] sm:$0xff]  ;;  %v711_v5 = vpack.c.bf16 %v262_v60, %v260_v59 }
  0x14   : > { %724 = vmatpush3.bf16.msra.mxu1 %v723_v50  ;;  %v416_v2 = vld [vmem:[%s1058_s3 + $0x38] sm:$0xff]  ;;  %v433_v3 = vld [vmem:[%s1058_s3 + $0xc0] sm:$0xff]  ;;  %v434_v4 = vld [vmem:[%s1058_s3 + $0xc8] sm:$0xff]  ;;  %v713_v6 = vpack.c.bf16 %v267_v63, %v265_v61 }
  0x15   : > { %700 = vmatpush1.bf16.msra.mxu0 %v699_v26  ;;  %726 = vmatprep.subr.bf16.mxu1 %v725_v52  ;;  %v264_v8 = vld [vmem:[%s1056_s1 + $0xe0] sm:$0xff]  ;;  %v266_v9 = vld [vmem:[%s1056_s1 + $0xf0] sm:$0xff]  ;;  %v731_v10 = vpack.c.bf16 %v416_v2, %v415_v1  ;;  %v733_v11 = vpack.c.bf16 %v434_v4, %v433_v3  ;;  %v418_v13 = vld [vmem:[%s1058_s3 + $0x48] sm:$0xff] }
  0x16   : > { %702 = vmatprep.subr.bf16.mxu0 %v701_v30  ;;  %v417_v12 = vld [vmem:[%s1058_s3 + $0x40] sm:$0xff]  ;;  %v435_v14 = vld [vmem:[%s1058_s3 + $0xd0] sm:$0xff]  ;;  %v436_v15 = vld [vmem:[%s1058_s3 + $0xd8] sm:$0xff]  ;;  %v715_v16 = vpack.c.bf16 %v266_v9, %v264_v8 }
  0x17   : > { %v735_v17 = vpack.c.bf16 %v418_v13, %v417_v12  ;;  %v737_v18 = vpack.c.bf16 %v436_v15, %v435_v14  ;;  %v419_v19 = vld [vmem:[%s1058_s3 + $0x50] sm:$0xff]  ;;  %v420_v20 = vld [vmem:[%s1058_s3 + $0x58] sm:$0xff]  ;;  %v437_v21 = vld [vmem:[%s1058_s3 + $0xe0] sm:$0xff] }
  0x18   : > { %728 = vmatpush3.bf16.msra.mxu1 %v727_v62  ;;  %v438_v22 = vld [vmem:[%s1058_s3 + $0xe8] sm:$0xff]  ;;  %v228_v23 = vld [vmem:[%s984_s14] sm:$0xff]  ;;  %v739_v24 = vpack.c.bf16 %v420_v20, %v419_v19  ;;  %v230_v27 = vld [vmem:[%s984_s14 + $0x10] sm:$0xff] }
  0x19   : > { %704 = vmatpush1.bf16.msra.mxu0 %v703_v42  ;;  %730 = vmatprep.subr.bf16.mxu1 %v729_v0  ;;  %v741_v25 = vpack.c.bf16 %v438_v22, %v437_v21  ;;  %v229_v26 = vld [vmem:[%s984_s14 + $0x8] sm:$0xff]  ;;  %v231_v28 = vld [vmem:[%s984_s14 + $0x18] sm:$0xff]  ;;  %v232_v29 = vld [vmem:[%s984_s14 + $0x20] sm:$0xff]  ;;  %v271_v42 = vshrl.u32 %v270_v41, 7 }
  0x1a   : > { %706 = vmatprep.subr.bf16.mxu0 %v705_v46  ;;  %v233_v30 = vld [vmem:[%s984_s14 + $0x28] sm:$0xff]  ;;  %v234_v31 = vld [vmem:[%s984_s14 + $0x30] sm:$0xff]  ;;  %v235_v32 = vld [vmem:[%s984_s14 + $0x38] sm:$0xff] }
  0x1b   : > { %v421_v33 = vld [vmem:[%s1058_s3 + $0x60] sm:$0xff]  ;;  %v422_v34 = vld [vmem:[%s1058_s3 + $0x68] sm:$0xff]  ;;  %v439_v36 = vld [vmem:[%s1058_s3 + $0xf0] sm:$0xff]  ;;  %v272_v43 = vsub.s32 0, %v271_v42  ;;  %v276_v45 = vsub.s32 1, %v271_v42 }
  0x1c   : > { %732 = vmatpush3.bf16.msra.mxu1 %v731_v10  ;;  %v743_v35 = vpack.c.bf16 %v422_v34, %v421_v33  ;;  %v423_v38 = vld [vmem:[%s1058_s3 + $0x70] sm:$0xff]  ;;  %v424_v39 = vld [vmem:[%s1058_s3 + $0x78] sm:$0xff]  ;;  %v268_v44 = vld [vmem:[%s1057_s2] sm:$0x3] }
  0x1d   : > { %708 = vmatpush1.bf16.msra.mxu0 %v707_v57  ;;  %734 = vmatprep.subr.bf16.mxu1 %v733_v11  ;;  %v747_v40 = vpack.c.bf16 %v424_v39, %v423_v38  ;;  %v273_v46 = vrot.slane %v268_v44, %v272_v43  ;;  %v277_v47 = vrot.slane %v268_v44, %v276_v45  ;;  %v626_v34 = vld [vmem:[%s1059_s4] ss:$0 sm:$0xff] }
  0x1e   : > { %710 = vmatprep.subr.bf16.mxu0 %v709_v58 }
  0x20   : > { %736 = vmatpush3.bf16.msra.mxu1 %v735_v17 }
  0x21   : > { %712 = vmatpush1.bf16.msra.mxu0 %v711_v5  ;;  %738 = vmatprep.subr.bf16.mxu1 %v737_v18 }
  0x22   : > { %714 = vmatprep.subr.bf16.mxu0 %v713_v6 }
  0x24   : > { %740 = vmatpush3.bf16.msra.mxu1 %v739_v24 }
  0x25   : > { %716 = vmatpush1.bf16.msra.mxu0 %v715_v16  ;;  %742 = vmatprep.subr.bf16.mxu1 %v741_v25 }
  0x28   : > { %345 = vmatmul.mubr.f32.vlgmr.msra.gmra.mrb[0].mxu0 %v228_v23  ;;  %744 = vmatpush3.bf16.msra.mxu1 %v743_v35 }
  0x29   : > { %350 = vmatprep.mubr.f32.mxu0 %v766_v7 }
  0x2c   : > { %351 = vmatmul.mubr.f32.gmra.mrb[2].mxu0 %v229_v26 }
  0x2d   : > { %356 = vmatprep.mubr.f32.mxu0 %v766_v7 }
  0x30   : > { %357 = vmatmul.mubr.f32.gmra.mrb[4].mxu0 %v230_v27 }
  0x31   : > { %362 = vmatprep.mubr.f32.mxu0 %v766_v7 }
  0x34   : > { %363 = vmatmul.mubr.f32.gmra.mrb[6].mxu0 %v231_v28 }
  0x35   : > { %368 = vmatprep.mubr.f32.mxu0 %v766_v7 }
  0x38   : > { %369 = vmatmul.mubr.f32.gmra.mrb[8].mxu0 %v232_v29 }
  0x39   : > { %374 = vmatprep.mubr.f32.mxu0 %v766_v7 }
  0x3c   : > { %375 = vmatmul.mubr.f32.gmra.mrb[10].mxu0 %v233_v30 }
  0x3d   : > { %380 = vmatprep.mubr.f32.mxu0 %v766_v7 }
  0x40   : > { %381 = vmatmul.mubr.f32.gmra.mrb[12].mxu0 %v234_v31 }
  0x41   : > { %386 = vmatprep.mubr.f32.mxu0 %v766_v7  ;;  %v440_v7 = vld [vmem:[%s1058_s3 + $0xf8] sm:$0xff] }
  0x42   : > { %v745_v37 = vpack.c.bf16 %v440_v7, %v439_v36 }
  0x44   : > { %387 = vmatmul.mubr.f32.gmra.mrb[14].mxu0 %v235_v32  ;;  %746 = vmatprep.subr.bf16.mxu1 %v745_v37 }
  0x45   : > { %748 = vmatpush3.bf16.msra.mxu1 %v747_v40 }
  0xfb   : > { %v346_v48 = vpop.f32.mrb[0].mxu0 }
  0xfc   : > { %v347_v49 = vadd.f32 %v346_v48, %v273_v46  ;;  %v348_v50 = vpop.f32.mrb[1].mxu0 }
  0xfd   : > { %v349_v51 = vadd.f32 %v348_v50, %v277_v47 }
  0xfe   : > { %v393_v54 = vmax.f32 %v347_v49, 0.0 }
  0xff   : > { %v352_v52 = vpop.f32.mrb[2].mxu0  ;;  %v394_v53 = vmax.f32 %v349_v51, 0.0 }
 0x100   : > { %v353_v55 = vadd.f32 %v352_v52, %v273_v46  ;;  %v354_v56 = vpop.f32.mrb[3].mxu0 }
 0x101   : > { %v355_v57 = vadd.f32 %v354_v56, %v277_v47  ;;  %512 = vmatprep.mubr.f32.mxu1 %v394_v53 }
 0x102   : > { %513 = vmatmul.mubr.f32.vlgmr.msra.gmra.mrb[0].mxu1 %v393_v54  ;;  %v395_v60 = vmax.f32 %v353_v55, 0.0 }
 0x103   : > { %v396_v58 = vmax.f32 %v355_v57, 0.0  ;;  %v358_v59 = vpop.f32.mrb[4].mxu0 }
 0x104   : > { %v359_v61 = vadd.f32 %v358_v59, %v273_v46  ;;  %v360_v62 = vpop.f32.mrb[5].mxu0 }
 0x105   : > { %v361_v63 = vadd.f32 %v360_v62, %v277_v47  ;;  %517 = vmatprep.mubr.f32.mxu1 %v396_v58 }
 0x106   : > { %518 = vmatmul.mubr.f32.gmra.mrb[2].mxu1 %v395_v60  ;;  %v397_v2 = vmax.f32 %v359_v61, 0.0 }
 0x107   : > { %v398_v0 = vmax.f32 %v361_v63, 0.0  ;;  %v364_v1 = vpop.f32.mrb[6].mxu0 }
 0x108   : > { %v365_v3 = vadd.f32 %v364_v1, %v273_v46  ;;  %v366_v4 = vpop.f32.mrb[7].mxu0 }
 0x109   : > { %v367_v5 = vadd.f32 %v366_v4, %v277_v47  ;;  %522 = vmatprep.mubr.f32.mxu1 %v398_v0 }
 0x10a   : > { %523 = vmatmul.mubr.f32.gmra.mrb[4].mxu1 %v397_v2  ;;  %v399_v9 = vmax.f32 %v365_v3, 0.0 }
 0x10b   : > { %v400_v6 = vmax.f32 %v367_v5, 0.0  ;;  %v370_v8 = vpop.f32.mrb[8].mxu0 }
 0x10c   : > { %v371_v10 = vadd.f32 %v370_v8, %v273_v46  ;;  %v372_v11 = vpop.f32.mrb[9].mxu0 }
 0x10d   : > { %v373_v12 = vadd.f32 %v372_v11, %v277_v47  ;;  %527 = vmatprep.mubr.f32.mxu1 %v400_v6 }
 0x10e   : > { %528 = vmatmul.mubr.f32.gmra.mrb[6].mxu1 %v399_v9  ;;  %v401_v15 = vmax.f32 %v371_v10, 0.0 }
 0x10f   : > { %v402_v13 = vmax.f32 %v373_v12, 0.0  ;;  %v376_v14 = vpop.f32.mrb[10].mxu0 }
 0x110   : > { %v377_v16 = vadd.f32 %v376_v14, %v273_v46  ;;  %v378_v17 = vpop.f32.mrb[11].mxu0 }
 0x111   : > { %v379_v18 = vadd.f32 %v378_v17, %v277_v47  ;;  %532 = vmatprep.mubr.f32.mxu1 %v402_v13 }
 0x112   : > { %533 = vmatmul.mubr.f32.gmra.mrb[8].mxu1 %v401_v15  ;;  %v403_v21 = vmax.f32 %v377_v16, 0.0 }
 0x113   : > { %v404_v19 = vmax.f32 %v379_v18, 0.0  ;;  %v382_v20 = vpop.f32.mrb[12].mxu0 }
 0x114   : > { %v383_v22 = vadd.f32 %v382_v20, %v273_v46  ;;  %v384_v23 = vpop.f32.mrb[13].mxu0 }
 0x115   : > { %v385_v24 = vadd.f32 %v384_v23, %v277_v47  ;;  %537 = vmatprep.mubr.f32.mxu1 %v404_v19 }
 0x116   : > { %538 = vmatmul.mubr.f32.gmra.mrb[10].mxu1 %v403_v21  ;;  %v405_v27 = vmax.f32 %v383_v22, 0.0 }
 0x117   : > { %v406_v25 = vmax.f32 %v385_v24, 0.0  ;;  %v388_v26 = vpop.f32.mrb[14].mxu0 }
 0x118   : > { %v389_v28 = vadd.f32 %v388_v26, %v273_v46  ;;  %v390_v29 = vpop.f32.mrb[15].mxu0 }
 0x119   : > { %v391_v30 = vadd.f32 %v390_v29, %v277_v47  ;;  %542 = vmatprep.mubr.f32.mxu1 %v406_v25 }
 0x11a   : > { %543 = vmatmul.mubr.f32.gmra.mrb[12].mxu1 %v405_v27  ;;  %v407_v32 = vmax.f32 %v389_v28, 0.0 }
 0x11b   : > { %v408_v31 = vmax.f32 %v391_v30, 0.0 }
 0x11d   : > { %547 = vmatprep.mubr.f32.mxu1 %v408_v31 }
 0x11e   : > { %548 = vmatmul.mubr.f32.gmra.mrb[14].mxu1 %v407_v32 }
 0x1d5   : > { %v661_v33 = vpop.f32.mrb[0].mxu1 }
 0x1d6   : > { %v662_v35 = vpop.f32.mrb[1].mxu1 }
 0x1d7   : > { %v663_v36 = vadd.f32 %v662_v35, %v661_v33 }
 0x1d9   : > { %v515_v7 = vadd.f32 %v663_v36, %v626_v34  ;;  %v664_v37 = vpop.f32.mrb[2].mxu1 }
 0x1da   : > { %v665_v38 = vpop.f32.mrb[3].mxu1 }
 0x1db   : > { %553 = vst [vmem:[%s1042_s21] sm:$0xff] %v515_v7  ;;  %v666_v39 = vadd.f32 %v665_v38, %v664_v37 }
 0x1dd   : > { %v520_v40 = vadd.f32 %v666_v39, %v626_v34  ;;  %v667_v41 = vpop.f32.mrb[4].mxu1 }
 0x1de   : > { %v668_v42 = vpop.f32.mrb[5].mxu1 }
 0x1df   : > { %554 = vst [vmem:[%s1042_s21 + $0x8] sm:$0xff] %v520_v40  ;;  %v669_v43 = vadd.f32 %v668_v42, %v667_v41 }
 0x1e1   : > { %v525_v44 = vadd.f32 %v669_v43, %v626_v34  ;;  %v670_v45 = vpop.f32.mrb[6].mxu1 }
 0x1e2   : > { %v671_v46 = vpop.f32.mrb[7].mxu1 }
 0x1e3   : > { %555 = vst [vmem:[%s1042_s21 + $0x10] sm:$0xff] %v525_v44  ;;  %v672_v47 = vadd.f32 %v671_v46, %v670_v45 }
 0x1e5   : > { %v530_v48 = vadd.f32 %v672_v47, %v626_v34  ;;  %v673_v49 = vpop.f32.mrb[8].mxu1 }
 0x1e6   : > { %v674_v50 = vpop.f32.mrb[9].mxu1 }
 0x1e7   : > { %556 = vst [vmem:[%s1042_s21 + $0x18] sm:$0xff] %v530_v48  ;;  %v675_v51 = vadd.f32 %v674_v50, %v673_v49 }
 0x1e9   : > { %v535_v52 = vadd.f32 %v675_v51, %v626_v34  ;;  %v676_v53 = vpop.f32.mrb[10].mxu1 }
 0x1ea   : > { %v677_v54 = vpop.f32.mrb[11].mxu1 }
 0x1eb   : > { %557 = vst [vmem:[%s1042_s21 + $0x20] sm:$0xff] %v535_v52  ;;  %v678_v55 = vadd.f32 %v677_v54, %v676_v53 }
 0x1ed   : > { %v540_v56 = vadd.f32 %v678_v55, %v626_v34  ;;  %v679_v57 = vpop.f32.mrb[12].mxu1 }
 0x1ee   : > { %v680_v58 = vpop.f32.mrb[13].mxu1 }
 0x1ef   : > { %558 = vst [vmem:[%s1042_s21 + $0x28] sm:$0xff] %v540_v56  ;;  %v681_v59 = vadd.f32 %v680_v58, %v679_v57 }
 0x1f1   : > { %v545_v60 = vadd.f32 %v681_v59, %v626_v34  ;;  %v682_v61 = vpop.f32.mrb[14].mxu1 }
 0x1f2   : > { %v683_v62 = vpop.f32.mrb[15].mxu1 }
 0x1f3   : > { %559 = vst [vmem:[%s1042_s21 + $0x30] sm:$0xff] %v545_v60  ;;  %v684_v63 = vadd.f32 %v683_v62, %v682_v61 }
 0x1f5   : > { %v550_v0 = vadd.f32 %v684_v63, %v626_v34 }
 0x1f7   : > { %560 = vst [vmem:[%s1042_s21 + $0x38] sm:$0xff] %v550_v0 }
 0x1f8 PF: > { %s15_s18 = sadd.s32 1, %s764_s18  }
 0x1f9   : > { %p12_p4 = scmp.ge.s32.totalorder %s15_s18, 4  }
 0x1fb   :  { %14 = sbr.rel (!%p12_p4) target bundleno = 1 (0x1), region = 70 }

</bundles_post_ra>
